<compile_context>
chip_gen: v6e
topology: v6e:2x2x1
jax: 0.10.0
libtpu: 0.0.40
codegen_flags: <defaults>
</compile_context>

<pallas_src>
import math

import jax
import jax.numpy as jnp
from jax.experimental import pallas as pl
from jax.experimental.pallas import tpu as pltpu

LANE = 128


def _pad2(a, rows, cols):
    a = a.astype(jnp.float32)
    return jnp.pad(a, ((0, rows - a.shape[0]), (0, cols - a.shape[1])))


# ------------------------------ fused kernel -------------------------------

def _make_fused_kernel(n_patch_rows, n_lat_rows, mse_count,
                       off_wpatch, off_wproj, off_vecs, off_basew, off_wface,
                       k_pad, face_in):
    """Builds the fused loss kernel with static packed-constant offsets."""

    def kernel(wts_ref, consts_ref, live_ref, img_ref, o_ref):
        # ---- static views into the packed constant block (zero runtime cost) --
        w_patch = consts_ref[pl.ds(off_wpatch, k_pad), :]        # (128, 128)
        w_proj = consts_ref[pl.ds(off_wproj, k_pad), :]          # (128, 128)
        vecs = consts_ref[pl.ds(off_vecs, 8), :]                 # (8, 128)
        base_w = consts_ref[pl.ds(off_basew, n_lat_rows), :]     # (8, 128)
        w_face = consts_ref[pl.ds(off_wface, face_in), :]        # (768, 128)

        bias_row = vecs[0:1, :]                                  # (1, 128)
        text_enc = vecs[1:2, :]                                  # (1, 128)
        base_face = vecs[2:3, :]                                 # (1, 128)

        patches = live_ref[pl.ds(0, n_patch_rows), :]            # (16, 128)
        w_lat = live_ref[pl.ds(n_patch_rows, n_lat_rows), :]     # (8, 128)

        # -------- CLIP branch (normalization + mean-pool folded at init) -------
        h = jnp.tanh(jnp.dot(patches, w_patch,
                             preferred_element_type=jnp.float32) + bias_row)
        hsum = jnp.sum(h, axis=0, keepdims=True)                 # (1, 128)
        e = jnp.dot(hsum, w_proj, preferred_element_type=jnp.float32)
        cos = jnp.sum(e * text_enc) * jax.lax.rsqrt(jnp.sum(e * e) + 1e-12)
        # logit_scale.exp() = 100 exactly cancels the /100 in the loss.
        clip_loss = 1.0 - cos

        # -------- face-id branch (base embedding precomputed, unit-norm) -------
        a = jnp.dot(img_ref[...], w_face, preferred_element_type=jnp.float32)
        id_loss = 1.0 - jnp.sum(a * base_face) * jax.lax.rsqrt(jnp.sum(a * a) + 1e-12)

        # -------- latent-delta (MSE) branch -------------------------------------
        d = w_lat - base_w                                       # padded cols are 0
        delta_loss = jnp.sum(d * d) * (1.0 / mse_count)          # true element count

        # mirrors "if id_weight > 0.0: ..." gating of the original module
        iw = jnp.maximum(wts_ref[0], 0.0)
        dw = jnp.maximum(wts_ref[1], 0.0)
        o_ref[0] = clip_loss + id_loss * iw + delta_loss * dw
        o_ref[1] = clip_loss
        o_ref[2] = id_loss
        o_ref[3] = delta_loss

    return kernel


# ------------------------------ loss module --------------------------------

class SoloClipSwapLossPallas:
    """Pallas re-implementation of SoloClipSwapLoss.forward with synthetic weights."""

    _MEAN = (0.48145466, 0.4578275, 0.40821073)
    _STD = (0.26862954, 0.26130258, 0.27577711)

    def __init__(self, base_img, base_gender, base_w,
                 input_resolution=16, patch=4, d_model=64, d_embed=32, d_face=64):
        self.input_resolution = int(input_resolution)
        self.patch = int(patch)
        self.base_img_shape = tuple(base_img.shape)

        b, c, hh, ww = base_img.shape
        assert b == 1
        r = self.input_resolution
        p = self.patch
        assert r % p == 0
        n_patches = (r // p) ** 2
        patch_dim = c * p * p
        face_in = c * hh * ww
        assert n_patches % 8 == 0 and face_in % 8 == 0
        assert patch_dim <= LANE and d_model <= LANE and d_embed <= LANE and d_face <= LANE

        # TODO(synk): pretrained CLIP ViT-B/32 image tower + ArcFace id model are
        # checkpoint loads in the original; replaced with small deterministic random
        # projections with the same forward structure (encode -> normalize -> cosine).
        kp = jax.random.PRNGKey(42)
        k1, k2, k3, k4 = jax.random.split(kp, 4)
        w_patch = jax.random.normal(k1, (patch_dim, d_model), jnp.float32) / math.sqrt(patch_dim)
        w_proj = jax.random.normal(k2, (d_model, d_embed), jnp.float32) / math.sqrt(d_model)
        w_face = jax.random.normal(k3, (face_in, d_face), jnp.float32) / math.sqrt(face_in)

        # TODO(synk): clip.tokenize / encode_text (text tower) has no in-script
        # equivalent; the gender-conditioned mean text embedding is replaced by a
        # deterministic unit vector (mirrors: mean of embellished prompts, renormed).
        texts = jax.random.normal(k4, (2, d_embed), jnp.float32)
        texts = texts / jnp.linalg.norm(texts, axis=-1, keepdims=True)
        gender = float(base_gender[0])
        assert gender in (0.0, 1.0)
        text_enc = texts[0] if gender == 0.0 else texts[1]           # (d_embed,)

        # ---- fold CLIP input normalization + mean-pool into the constants ------
        #   ((x+1)/2 - mean)/std == x*(0.5/std) + (0.5-mean)/std
        mean = jnp.array(self._MEAN, jnp.float32)
        std = jnp.array(self._STD, jnp.float32)
        scale_vec = jnp.repeat(0.5 / std, p * p)                      # (patch_dim,)
        bias_vec = jnp.repeat((0.5 - mean) / std, p * p)              # (patch_dim,)
        w_patch_scaled = w_patch * scale_vec[:, None]
        bias_row = bias_vec[None, :] @ w_patch                        # (1, d_model)
        w_proj_div = w_proj / float(n_patches)                        # mean -> sum

        # Constant base face embedding, unit-normalized once (plain JAX, init-time).
        base_flat = base_img.reshape(1, -1).astype(jnp.float32)
        bf = base_flat @ w_face
        base_face = bf * jax.lax.rsqrt(jnp.sum(bf * bf) + 1e-12)      # (1, d_face)

        base_w = base_w.astype(jnp.float32)
        self.base_w_shape = tuple(base_w.shape)
        n_lat = base_w.shape[0] * base_w.shape[1]
        d_lat = base_w.shape[2]
        assert n_lat % 8 == 0 and d_lat <= LANE
        mse_count = float(n_lat * d_lat)

        # ---- pack every constant operand into ONE lane-dense (rows, 128) block --
        k_pad = LANE
        blk_wpatch = _pad2(w_patch_scaled, k_pad, LANE)               # (128, 128)
        blk_wproj = _pad2(w_proj_div, k_pad, LANE)                    # (128, 128)
        vec_blk = jnp.zeros((8, LANE), jnp.float32)
        vec_blk = vec_blk.at[0, :d_model].set(bias_row[0])
        vec_blk = vec_blk.at[1, :d_embed].set(text_enc)
        vec_blk = vec_blk.at[2, :d_face].set(base_face[0])
        blk_basew = _pad2(base_w.reshape(n_lat, d_lat), n_lat, LANE)  # (8, 128)
        blk_wface = _pad2(w_face, face_in, LANE)                      # (768, 128)

        off_wpatch = 0
        off_wproj = off_wpatch + k_pad
        off_vecs = off_wproj + k_pad
        off_basew = off_vecs + 8
        off_wface = off_basew + n_lat
        self.consts = jnp.concatenate(
            [blk_wpatch, blk_wproj, vec_blk, blk_basew, blk_wface], axis=0)

        self._n_patches = n_patches
        self._patch_dim = patch_dim
        self._n_lat = n_lat
        self._d_lat = d_lat

        kernel = _make_fused_kernel(
            n_patch_rows=n_patches, n_lat_rows=n_lat, mse_count=mse_count,
            off_wpatch=off_wpatch, off_wproj=off_wproj, off_vecs=off_vecs,
            off_basew=off_basew, off_wface=off_wface,
            k_pad=k_pad, face_in=face_in)

        # Single fused, grid-less pallas_call: 3 VMEM array inputs + 1 SMEM scalar
        # pair in, only a (4,) scalar vector out through SMEM.
        self._fused_call = pl.pallas_call(
            kernel,
            out_shape=jax.ShapeDtypeStruct((4,), jnp.float32),
            in_specs=[
                pl.BlockSpec(memory_space=pltpu.MemorySpace.SMEM),   # [id_w, delta_w]
                pl.BlockSpec(memory_space=pltpu.MemorySpace.VMEM),   # packed constants
                pl.BlockSpec(memory_space=pltpu.MemorySpace.VMEM),   # live block
                pl.BlockSpec(memory_space=pltpu.MemorySpace.VMEM),   # flat image
            ],
            out_specs=pl.BlockSpec(memory_space=pltpu.MemorySpace.SMEM),
        )
        # TODO(synk): if many (img, w) candidates are scored per optimizer step, add
        # a leading "parallel" grid axis over candidates (constants mapped to block 0)
        # to amortize dispatch/DMA cost and use v7x's second TensorCore; the module's
        # forward is single-sample (assert img.shape[0] == 1), so no grid here.

        self._forward = jax.jit(self._forward_impl)

    # ------------------------------------------------------------------ forward
    def _forward_impl(self, img, w, weights):
        r = self.input_resolution
        p = self.patch
        b, c, hh, ww = img.shape
        assert b == 1
        # face branch flattens the full-res image against w_face built from base_img.
        assert (c, hh, ww) == self.base_img_shape[1:], "img must match base_img shape"
        assert tuple(w.shape) == self.base_w_shape

        # TODO(synk): bilinear resize stays as one XLA op (glue), skipped when the
        # image is already at the CLIP input resolution (identity resize).
        if (hh, ww) != (r, r):
            resized = jax.image.resize(img, (1, c, r, r), method="bilinear")
        else:
            resized = img
        resized = resized.astype(jnp.float32)

        # TODO(synk): patch extraction (reshape/transpose/pad) left to XLA so it
        # fuses into a single tiny producer op; an in-kernel relayout of the 16x48
        # patch matrix was judged not worth the Mosaic reshape risk.
        g = r // p
        patches = resized.reshape(1, c, g, p, g, p)
        patches = patches.transpose(0, 2, 4, 1, 3, 5).reshape(g * g, c * p * p)
        patches = jnp.pad(patches, ((0, 0), (0, LANE - self._patch_dim)))

        w_flat = w.astype(jnp.float32).reshape(self._n_lat, self._d_lat)
        w_flat = jnp.pad(w_flat, ((0, 0), (0, LANE - self._d_lat)))

        live = jnp.concatenate([patches, w_flat], axis=0)        # (n_patches+n_lat, 128)
        img_flat = img.reshape(1, -1).astype(jnp.float32)        # (1, face_in)

        out = self._fused_call(weights, self.consts, live, img_flat)
        return out[0]   # [total, clip_loss, id_loss, delta_loss] -> total

    def __call__(self, img, w, id_weight, delta_weight):
        weights = jnp.asarray([id_weight, delta_weight], jnp.float32)
        return self._forward(img, w, weights)


# ------------------------------------ main ---------------------------------

if __name__ == "__main__":
    key = jax.random.PRNGKey(0)
    k1, k2, k3, k4 = jax.random.split(key, 4)
    img = jax.random.uniform(k1, (1, 3, 16, 16), jnp.float32, -1.0, 1.0)
    base_img = jax.random.uniform(k2, (1, 3, 16, 16), jnp.float32, -1.0, 1.0)
    w = jax.random.normal(k3, (1, 8, 32), jnp.float32)
    base_w = jax.random.normal(k4, (1, 8, 32), jnp.float32)
    base_gender = jnp.array([1.0], jnp.float32)

    loss_mod = SoloClipSwapLossPallas(base_img, base_gender, base_w)
    total = loss_mod(img, w, id_weight=0.1, delta_weight=0.5)
    total = jax.block_until_ready(total)

    assert total.shape == ()
    assert bool(jnp.isfinite(total))
    print("KERNEL_OK")
</pallas_src>

<mosaic_0001>
module attributes {stable_mosaic.version = 11 : i64} {
  func.func @kernel(%arg0: memref<2xf32, #tpu.memory_space<smem>>, %arg1: memref<1040x128xf32, #tpu.memory_space<vmem>>, %arg2: memref<24x128xf32, #tpu.memory_space<vmem>>, %arg3: memref<1x768xf32, #tpu.memory_space<vmem>>, %arg4: memref<4xf32, #tpu.memory_space<smem>>) attributes {dimension_semantics = [], scalar_prefetch = 0 : i64, scratch_operands = 0 : i64, tpu.core_type = #tpu.core_type<tc>} {
    %c0 = arith.constant 0 : index
    %c0_0 = arith.constant 0 : index
    %0 = vector.load %arg1[%c0, %c0_0] : memref<1040x128xf32, #tpu.memory_space<vmem>>, vector<128x128xf32>
    %c128 = arith.constant 128 : index
    %c0_1 = arith.constant 0 : index
    %1 = vector.load %arg1[%c128, %c0_1] : memref<1040x128xf32, #tpu.memory_space<vmem>>, vector<128x128xf32>
    %c256 = arith.constant 256 : index
    %c0_2 = arith.constant 0 : index
    %2 = vector.load %arg1[%c256, %c0_2] : memref<1040x128xf32, #tpu.memory_space<vmem>>, vector<8x128xf32>
    %c264 = arith.constant 264 : index
    %c0_3 = arith.constant 0 : index
    %3 = vector.load %arg1[%c264, %c0_3] : memref<1040x128xf32, #tpu.memory_space<vmem>>, vector<8x128xf32>
    %c272 = arith.constant 272 : index
    %c0_4 = arith.constant 0 : index
    %4 = vector.load %arg1[%c272, %c0_4] : memref<1040x128xf32, #tpu.memory_space<vmem>>, vector<768x128xf32>
    %5 = vector.extract_strided_slice %2 {offsets = [0, 0], sizes = [1, 128], strides = [1, 1]} : vector<8x128xf32> to vector<1x128xf32>
    %6 = vector.extract_strided_slice %2 {offsets = [1, 0], sizes = [1, 128], strides = [1, 1]} : vector<8x128xf32> to vector<1x128xf32>
    %7 = vector.extract_strided_slice %2 {offsets = [2, 0], sizes = [1, 128], strides = [1, 1]} : vector<8x128xf32> to vector<1x128xf32>
    %c0_5 = arith.constant 0 : index
    %c0_6 = arith.constant 0 : index
    %8 = vector.load %arg2[%c0_5, %c0_6] : memref<24x128xf32, #tpu.memory_space<vmem>>, vector<16x128xf32>
    %c16 = arith.constant 16 : index
    %c0_7 = arith.constant 0 : index
    %9 = vector.load %arg2[%c16, %c0_7] : memref<24x128xf32, #tpu.memory_space<vmem>>, vector<8x128xf32>
    %cst = arith.constant dense<0.000000e+00> : vector<16x128xf32>
    %10 = tpu.matmul %8, %0, %cst {dimension_numbers = #tpu.dot_dimension_numbers<[1], [0], [0], [1], [0, 0, 1, 1], [], []>} : vector<16x128xf32>, vector<128x128xf32>, vector<16x128xf32> -> vector<16x128xf32>
    %11 = vector.broadcast %5 : vector<1x128xf32> to vector<16x128xf32>
    %12 = arith.addf %10, %11 : vector<16x128xf32>
    %13 = math.tanh %12 : vector<16x128xf32>
    %cst_8 = arith.constant dense<0.000000e+00> : vector<128xf32>
    %14 = vector.multi_reduction <add>, %13, %cst_8 [0] : vector<16x128xf32> to vector<128xf32>
    %15 = vector.shape_cast %14 : vector<128xf32> to vector<1x128xf32>
    %cst_9 = arith.constant dense<0.000000e+00> : vector<1x128xf32>
    %16 = tpu.matmul %15, %1, %cst_9 {dimension_numbers = #tpu.dot_dimension_numbers<[1], [0], [0], [1], [0, 0, 1, 1], [], []>} : vector<1x128xf32>, vector<128x128xf32>, vector<1x128xf32> -> vector<1x128xf32>
    %17 = arith.mulf %16, %6 : vector<1x128xf32>
    %18 = vector.shape_cast %17 : vector<1x128xf32> to vector<1x1x128xf32>
    %cst_10 = arith.constant dense<0.000000e+00> : vector<1xf32>
    %19 = vector.multi_reduction <add>, %18, %cst_10 [1, 2] : vector<1x1x128xf32> to vector<1xf32>
    %20 = vector.shape_cast %19 : vector<1xf32> to vector<1x1x1xf32>
    %21 = vector.extract %20[0, 0, 0] : f32 from vector<1x1x1xf32>
    %22 = arith.mulf %16, %16 : vector<1x128xf32>
    %23 = vector.shape_cast %22 : vector<1x128xf32> to vector<1x1x128xf32>
    %cst_11 = arith.constant dense<0.000000e+00> : vector<1xf32>
    %24 = vector.multi_reduction <add>, %23, %cst_11 [1, 2] : vector<1x1x128xf32> to vector<1xf32>
    %25 = vector.shape_cast %24 : vector<1xf32> to vector<1x1x1xf32>
    %26 = vector.extract %25[0, 0, 0] : f32 from vector<1x1x1xf32>
    %cst_12 = arith.constant 9.99999996E-13 : f32
    %27 = arith.addf %26, %cst_12 : f32
    %28 = math.rsqrt %27 : f32
    %29 = arith.mulf %21, %28 : f32
    %cst_13 = arith.constant 1.000000e+00 : f32
    %30 = arith.subf %cst_13, %29 : f32
    %c0_14 = arith.constant 0 : index
    %c0_15 = arith.constant 0 : index
    %31 = vector.load %arg3[%c0_14, %c0_15] : memref<1x768xf32, #tpu.memory_space<vmem>>, vector<1x768xf32>
    %cst_16 = arith.constant dense<0.000000e+00> : vector<1x128xf32>
    %32 = tpu.matmul %31, %4, %cst_16 {dimension_numbers = #tpu.dot_dimension_numbers<[1], [0], [0], [1], [0, 0, 1, 1], [], []>} : vector<1x768xf32>, vector<768x128xf32>, vector<1x128xf32> -> vector<1x128xf32>
    %33 = arith.mulf %32, %7 : vector<1x128xf32>
    %34 = vector.shape_cast %33 : vector<1x128xf32> to vector<1x1x128xf32>
    %cst_17 = arith.constant dense<0.000000e+00> : vector<1xf32>
    %35 = vector.multi_reduction <add>, %34, %cst_17 [1, 2] : vector<1x1x128xf32> to vector<1xf32>
    %36 = vector.shape_cast %35 : vector<1xf32> to vector<1x1x1xf32>
    %37 = vector.extract %36[0, 0, 0] : f32 from vector<1x1x1xf32>
    %38 = arith.mulf %32, %32 : vector<1x128xf32>
    %39 = vector.shape_cast %38 : vector<1x128xf32> to vector<1x1x128xf32>
    %cst_18 = arith.constant dense<0.000000e+00> : vector<1xf32>
    %40 = vector.multi_reduction <add>, %39, %cst_18 [1, 2] : vector<1x1x128xf32> to vector<1xf32>
    %41 = vector.shape_cast %40 : vector<1xf32> to vector<1x1x1xf32>
    %42 = vector.extract %41[0, 0, 0] : f32 from vector<1x1x1xf32>
    %cst_19 = arith.constant 9.99999996E-13 : f32
    %43 = arith.addf %42, %cst_19 : f32
    %44 = math.rsqrt %43 : f32
    %45 = arith.mulf %37, %44 : f32
    %cst_20 = arith.constant 1.000000e+00 : f32
    %46 = arith.subf %cst_20, %45 : f32
    %47 = arith.subf %9, %3 : vector<8x128xf32>
    %48 = arith.mulf %47, %47 : vector<8x128xf32>
    %49 = vector.shape_cast %48 : vector<8x128xf32> to vector<1x8x128xf32>
    %cst_21 = arith.constant dense<0.000000e+00> : vector<1xf32>
    %50 = vector.multi_reduction <add>, %49, %cst_21 [1, 2] : vector<1x8x128xf32> to vector<1xf32>
    %51 = vector.shape_cast %50 : vector<1xf32> to vector<1x1x1xf32>
    %52 = vector.extract %51[0, 0, 0] : f32 from vector<1x1x1xf32>
    %cst_22 = arith.constant 3.906250e-03 : f32
    %53 = arith.mulf %52, %cst_22 : f32
    %c0_23 = arith.constant 0 : index
    %54 = memref.load %arg0[%c0_23] : memref<2xf32, #tpu.memory_space<smem>>
    %cst_24 = arith.constant 0.000000e+00 : f32
    %55 = arith.maximumf %54, %cst_24 : f32
    %c1 = arith.constant 1 : index
    %56 = memref.load %arg0[%c1] : memref<2xf32, #tpu.memory_space<smem>>
    %cst_25 = arith.constant 0.000000e+00 : f32
    %57 = arith.maximumf %56, %cst_25 : f32
    %58 = arith.mulf %46, %55 : f32
    %59 = arith.addf %30, %58 : f32
    %60 = arith.mulf %53, %57 : f32
    %61 = arith.addf %59, %60 : f32
    %c0_26 = arith.constant 0 : index
    %62 = memref.load %arg4[%c0_26] : memref<4xf32, #tpu.memory_space<smem>>
    memref.store %61, %arg4[%c0_26] : memref<4xf32, #tpu.memory_space<smem>>
    %c1_27 = arith.constant 1 : index
    %63 = memref.load %arg4[%c1_27] : memref<4xf32, #tpu.memory_space<smem>>
    memref.store %30, %arg4[%c1_27] : memref<4xf32, #tpu.memory_space<smem>>
    %c2 = arith.constant 2 : index
    %64 = memref.load %arg4[%c2] : memref<4xf32, #tpu.memory_space<smem>>
    memref.store %46, %arg4[%c2] : memref<4xf32, #tpu.memory_space<smem>>
    %c3 = arith.constant 3 : index
    %65 = memref.load %arg4[%c3] : memref<4xf32, #tpu.memory_space<smem>>
    memref.store %53, %arg4[%c3] : memref<4xf32, #tpu.memory_space<smem>>
    return
  }
}

</mosaic_0001>

<bundles_post_ra>
// kernel: _forward_impl.1
= control target key start
LH: loop header
LB: loop body
LE: loop exit
PB: predicated region body
PF: predicated region fallthrough
CT: control target
= control target key end

     0   :  { %9 = vsyncpa [#allocation5], 0  ;;  %s1070_s0 = inlined_call_operand.vmem [shape: f32[2], index: 0, kind: input, shape index: {}]   ;;  %s1071_s1 = inlined_call_operand.hbm [shape: f32[1040,128], index: 1, kind: input, shape index: {}]   ;;  %s1072_s2 = inlined_call_operand.vmem [shape: f32[24,128], index: 2, kind: input, shape index: {}]   ;;  %s1073_s3 = inlined_call_operand.vmem [shape: f32[1,768], index: 3, kind: input, shape index: {}]   ;;  %s1074_s4 = inlined_call_operand.hbm [shape: f32[4], index: 4, kind: output, shape index: {}]  }
   0x1   :  { %10 = vsyncpa [#allocation3], 0 }
   0x2   :  { %11 = vsyncpa [#allocation4], 0  ;;  %s18_s17 = sshll.u32 %s1070_s0, 4  ;;  %s19_s17 = int_to_ptr.vmem [resolvable:$true] %s18_s17 }
   0x3   :  { %s924_s18 = scalar_lea.vmem %s19_s17, 16  ;;  %p929_p1 = scmp.lt.s32.totalorder %s19_s17, %s19_s17 }
   0x4   :  { %p925_p0 = scmp.ne.s32.totalorder %s19_s17, %s924_s18  ;;  %p930_p2 = scmp.lt.s32.totalorder %s924_s18, %s924_s18 }
   0x6   :  { %p931_p3 = por %p930_p2, %p929_p1 }
   0x8   :  { %p932_p4 = pnand %p931_p3, %p925_p0 }
   0xa   :  { %935 = shalt.err (!%p932_p4)
}
   0xb   :  { %s970_s19 = smov [#allocation2]   ;;  %s971_s20 = smov [#allocation6]  }
   0xc   :  { %21 = dma.vmem_to_smem %s19_s17, 16, %s970_s19, [#allocation5]  }
   0xd   :  { %s27_s21 = sshll.u32 %s971_s20, 4  ;;  %s28_s21 = int_to_ptr.vmem [resolvable:$true] %s27_s21 }
   0xe   :  { %s944_s22 = scalar_lea.vmem %s28_s21, 16640  ;;  %p949_p6 = scmp.lt.s32.totalorder %s28_s21, %s28_s21 }
   0xf   :  { %p945_p5 = scmp.ne.s32.totalorder %s28_s21, %s944_s22  ;;  %p950_p7 = scmp.lt.s32.totalorder %s944_s22, %s944_s22 }
  0x11   :  { %p951_p8 = por %p950_p7, %p949_p6 }
  0x13   :  { %p952_p9 = pnand %p951_p8, %p945_p5 }
  0x15   :  { %955 = shalt.err (!%p952_p9)
}
  0x16   :  { %s972_s0 = smov 128   ;;  %s973_s23 = smov 8  }
  0x17   :  { %33 = dma.hbm_to_vmem [thread:$0]  %s1071_s1, 16640, %s28_s21, [#allocation3], %s972_s0, %s972_s0, %s973_s23  }
  0x18   :  { %964 = dma.done.wait [#allocation5], 16  }
  0x19   :  { %965 = vsyncadd [#allocation5], 4294967280 }
  0x1a   :  { %966 = dma.done.wait [#allocation3], 16640  }
  0x1b   :  { %967 = vsyncadd [#allocation3], 4294950656 }
  0x1c   :  { %44 = sfence }
  0x1d   :  { %v60_v0 = vld [vmem:[#allocation6 + $0x78] sm:$0xff]  ;;  %v59_v1 = vld [vmem:[#allocation6 + $0x70] sm:$0xff]  ;;  %v58_v2 = vld [vmem:[#allocation6 + $0x68] sm:$0xff]  ;;  %v974_v18 = vmov 0.0   ;;  %v178_v54 = vlaneseq  ;;  %vm975_vm0 = vmmov 0   ;;  %vm340_vm1 = vcmask 1040384  }
  0x1e   :  { %824 = vmatprep.subr.mxu0 %v60_v0  ;;  %v57_v3 = vld [vmem:[#allocation6 + $0x60] sm:$0xff]  ;;  %v56_v5 = vld [vmem:[#allocation6 + $0x58] sm:$0xff]  ;;  %v55_v6 = vld [vmem:[#allocation6 + $0x50] sm:$0xff]  ;;  %859 = vmatprep.subr.mxu1 %v974_v18  ;;  %s652_s14 = sld [smem:[#allocation2]]  ;;  %s976_s19 = smov 0.0  }
  0x1f   :  { %825 = vmatpush3.msra.mxu0 %v60_v0  ;;  %v175_v4 = vld [vmem:[%s1072_s2] sm:$0xff]  ;;  %v54_v7 = vld [vmem:[#allocation6 + $0x48] sm:$0xff]  ;;  %v52_v9 = vld [vmem:[#allocation6 + $0x38] sm:$0xff]  ;;  %v1028_v61 = vshrl.u32 %v178_v54, 7  ;;  %891 = vmatprep.mubr.msk.f32.mxu1 %vm975_vm0, %v974_v18  ;;  %s683_s15 = sld [smem:[#allocation2 + $0x1]]  ;;  %s977_s27 = smov [#allocation7]  }
  0x20   :  { %826 = vmatprep.subr.mxu0 %v59_v1  ;;  %856 = vmatprep.mubr.f32.mxu0 %v175_v4  ;;  %v53_v8 = vld [vmem:[#allocation6 + $0x40] sm:$0xff]  ;;  %v51_v10 = vld [vmem:[#allocation6 + $0x30] sm:$0xff]  ;;  %v50_v11 = vld [vmem:[#allocation6 + $0x28] sm:$0xff] }
  0x21   :  { %827 = vmatpush3.msra.mxu0 %v59_v1  ;;  %v49_v12 = vld [vmem:[#allocation6 + $0x20] sm:$0xff]  ;;  %v48_v13 = vld [vmem:[#allocation6 + $0x18] sm:$0xff]  ;;  %v47_v14 = vld [vmem:[#allocation6 + $0x10] sm:$0xff] }
  0x22   :  { %828 = vmatprep.subr.mxu0 %v58_v2  ;;  %v46_v15 = vld [vmem:[#allocation6 + $0x8] sm:$0xff]  ;;  %v45_v16 = vld [vmem:[#allocation6] sm:$0xff]  ;;  %v76_v19 = vld [vmem:[#allocation6 + $0xf8] sm:$0xff] }
  0x23   :  { %829 = vmatpush3.msra.mxu0 %v58_v2  ;;  %v176_v17 = vld [vmem:[%s1072_s2 + $0x8] sm:$0xff]  ;;  %860 = vmatpush3.msra.mxu1 %v76_v19  ;;  %v75_v21 = vld [vmem:[#allocation6 + $0xf0] sm:$0xff]  ;;  %v109_v23 = vld [vmem:[#allocation6 + $0x200] sm:$0xff] }
  0x24   :  { %830 = vmatprep.subr.mxu0 %v57_v3  ;;  %v110_v20 = vld [vmem:[#allocation6 + $0x208] sm:$0xff]  ;;  %861 = vmatprep.subr.mxu1 %v974_v18  ;;  %v93_v25 = vld [vmem:[#allocation6 + $0x180] sm:$0xff]  ;;  %v108_v26 = vld [vmem:[#allocation6 + $0x1f8] sm:$0xff]  ;;  %s653_s20 = smax.f32 %s976_s19, %s652_s14 }
  0x25   :  { %831 = vmatpush3.msra.mxu0 %v57_v3  ;;  %v94_v22 = vld [vmem:[#allocation6 + $0x188] sm:$0xff]  ;;  %862 = vmatpush3.msra.mxu1 %v75_v21  ;;  %v73_v27 = vld [vmem:[#allocation6 + $0xe0] sm:$0xff]  ;;  %v92_v28 = vld [vmem:[#allocation6 + $0x178] sm:$0xff]  ;;  %s655_s0 = smax.f32 %s976_s19, %s683_s15 }
  0x26   :  { %832 = vmatprep.subr.mxu0 %v56_v5  ;;  %863 = vmatprep.subr.mxu1 %v974_v18  ;;  %v74_v24 = vld [vmem:[#allocation6 + $0xe8] sm:$0xff]  ;;  %v107_v29 = vld [vmem:[#allocation6 + $0x1f0] sm:$0xff]  ;;  %v72_v30 = vld [vmem:[#allocation6 + $0xd8] sm:$0xff] }
  0x27   :  { %833 = vmatpush3.msra.mxu0 %v56_v5  ;;  %864 = vmatpush3.msra.mxu1 %v74_v24  ;;  %v91_v31 = vld [vmem:[#allocation6 + $0x170] sm:$0xff]  ;;  %v106_v32 = vld [vmem:[#allocation6 + $0x1e8] sm:$0xff]  ;;  %v105_v35 = vld [vmem:[#allocation6 + $0x1e0] sm:$0xff]  ;;  %v180_v5 = vsub.s32 0, %v1028_v61 }
  0x28   :  { %834 = vmatprep.subr.mxu0 %v55_v6  ;;  %865 = vmatprep.subr.mxu1 %v974_v18  ;;  %v71_v33 = vld [vmem:[#allocation6 + $0xd0] sm:$0xff]  ;;  %v90_v34 = vld [vmem:[#allocation6 + $0x168] sm:$0xff]  ;;  %v89_v37 = vld [vmem:[#allocation6 + $0x160] sm:$0xff] }
  0x29   :  { %835 = vmatpush3.msra.mxu0 %v55_v6  ;;  %866 = vmatpush3.msra.mxu1 %v73_v27  ;;  %v70_v36 = vld [vmem:[#allocation6 + $0xc8] sm:$0xff]  ;;  %v104_v38 = vld [vmem:[#allocation6 + $0x1d8] sm:$0xff]  ;;  %v69_v39 = vld [vmem:[#allocation6 + $0xc0] sm:$0xff] }
  0x2a   :  { %836 = vmatprep.subr.mxu0 %v54_v7  ;;  %867 = vmatprep.subr.mxu1 %v974_v18  ;;  %v88_v40 = vld [vmem:[#allocation6 + $0x158] sm:$0xff]  ;;  %v103_v41 = vld [vmem:[#allocation6 + $0x1d0] sm:$0xff]  ;;  %v102_v44 = vld [vmem:[#allocation6 + $0x1c8] sm:$0xff] }
  0x2b   :  { %837 = vmatpush3.msra.mxu0 %v54_v7  ;;  %868 = vmatpush3.msra.mxu1 %v72_v30  ;;  %v68_v42 = vld [vmem:[#allocation6 + $0xb8] sm:$0xff]  ;;  %v87_v43 = vld [vmem:[#allocation6 + $0x150] sm:$0xff]  ;;  %v86_v46 = vld [vmem:[#allocation6 + $0x148] sm:$0xff]  ;;  %v376_v7 = vsub.s32 1, %v1028_v61 }
  0x2c   :  { %838 = vmatprep.subr.mxu0 %v53_v8  ;;  %869 = vmatprep.subr.mxu1 %v974_v18  ;;  %v67_v45 = vld [vmem:[#allocation6 + $0xb0] sm:$0xff]  ;;  %v101_v47 = vld [vmem:[#allocation6 + $0x1c0] sm:$0xff]  ;;  %v66_v48 = vld [vmem:[#allocation6 + $0xa8] sm:$0xff] }
  0x2d   :  { %839 = vmatpush3.msra.mxu0 %v53_v8  ;;  %870 = vmatpush3.msra.mxu1 %v71_v33  ;;  %v85_v49 = vld [vmem:[#allocation6 + $0x140] sm:$0xff]  ;;  %v100_v50 = vld [vmem:[#allocation6 + $0x1b8] sm:$0xff]  ;;  %v99_v53 = vld [vmem:[#allocation6 + $0x1b0] sm:$0xff] }
  0x2e   :  { %840 = vmatprep.subr.mxu0 %v52_v9  ;;  %871 = vmatprep.subr.mxu1 %v974_v18  ;;  %v65_v51 = vld [vmem:[#allocation6 + $0xa0] sm:$0xff]  ;;  %v84_v52 = vld [vmem:[#allocation6 + $0x138] sm:$0xff]  ;;  %v83_v56 = vld [vmem:[#allocation6 + $0x130] sm:$0xff] }
  0x2f   :  { %841 = vmatpush3.msra.mxu0 %v52_v9  ;;  %872 = vmatpush3.msra.mxu1 %v70_v36  ;;  %v64_v55 = vld [vmem:[#allocation6 + $0x98] sm:$0xff]  ;;  %v98_v57 = vld [vmem:[#allocation6 + $0x1a8] sm:$0xff]  ;;  %v63_v58 = vld [vmem:[#allocation6 + $0x90] sm:$0xff] }
  0x30   :  { %842 = vmatprep.subr.mxu0 %v51_v10  ;;  %873 = vmatprep.subr.mxu1 %v974_v18  ;;  %v82_v59 = vld [vmem:[#allocation6 + $0x128] sm:$0xff]  ;;  %v97_v60 = vld [vmem:[#allocation6 + $0x1a0] sm:$0xff]  ;;  %v96_v0 = vld [vmem:[#allocation6 + $0x198] sm:$0xff] }
  0x31   :  { %843 = vmatpush3.msra.mxu0 %v51_v10  ;;  %874 = vmatpush3.msra.mxu1 %v69_v39  ;;  %v62_v62 = vld [vmem:[#allocation6 + $0x88] sm:$0xff]  ;;  %v81_v63 = vld [vmem:[#allocation6 + $0x120] sm:$0xff]  ;;  %v80_v2 = vld [vmem:[#allocation6 + $0x118] sm:$0xff] }
  0x32   :  { %844 = vmatprep.subr.mxu0 %v50_v11  ;;  %875 = vmatprep.subr.mxu1 %v974_v18  ;;  %v61_v1 = vld [vmem:[#allocation6 + $0x80] sm:$0xff]  ;;  %v95_v4 = vld [vmem:[#allocation6 + $0x190] sm:$0xff]  ;;  %v142_v6 = vld [vmem:[#allocation6 + $0x308] sm:$0xff] }
  0x33   :  { %845 = vmatpush3.msra.mxu0 %v50_v11  ;;  %876 = vmatpush3.msra.mxu1 %v68_v42  ;;  %v1035_v3 = vld [vmem:[%s1073_s3] sm:$0x3f]  ;;  %v79_v9 = vld [vmem:[#allocation6 + $0x110] sm:$0xff]  ;;  %v174_v11 = vld [vmem:[#allocation6 + $0x408] sm:$0xff]  ;;  %v388_v42 = vsub.s32 4, %v1028_v61 }
  0x34   :  { %846 = vmatprep.subr.mxu0 %v49_v12  ;;  %877 = vmatprep.subr.mxu1 %v974_v18  ;;  %v373_v8 = vrot.slane %v1035_v3, %v180_v5  ;;  %v377_v10 = vrot.slane %v1035_v3, %v376_v7  ;;  %v170_v19 = vld [vmem:[#allocation6 + $0x3e8] sm:$0xff]  ;;  %v169_v21 = vld [vmem:[#allocation6 + $0x3e0] sm:$0xff]  ;;  %v152_v24 = vld [vmem:[#allocation6 + $0x358] sm:$0xff] }
  0x35   :  { %847 = vmatpush3.msra.mxu0 %v49_v12  ;;  %878 = vmatpush3.msra.mxu1 %v67_v45  ;;  %v158_v12 = vld [vmem:[#allocation6 + $0x388] sm:$0xff]  ;;  %v149_v30 = vld [vmem:[#allocation6 + $0x340] sm:$0xff]  ;;  %v163_v33 = vld [vmem:[#allocation6 + $0x3b0] sm:$0xff] }
  0x36   :  { %848 = vmatprep.subr.mxu0 %v48_v13  ;;  %879 = vmatprep.subr.mxu1 %v974_v18  ;;  %v166_v27 = vld [vmem:[#allocation6 + $0x3c8] sm:$0xff]  ;;  %v160_v39 = vld [vmem:[#allocation6 + $0x398] sm:$0xff]  ;;  %v143_v45 = vld [vmem:[#allocation6 + $0x310] sm:$0xff] }
  0x37   :  { %849 = vmatpush3.msra.mxu0 %v48_v13  ;;  %880 = vmatpush3.msra.mxu1 %v66_v48  ;;  %v173_v13 = vld [vmem:[#allocation6 + $0x400] sm:$0xff]  ;;  %v146_v36 = vld [vmem:[#allocation6 + $0x328] sm:$0xff]  ;;  %v139_v7 = vld [vmem:[#allocation6 + $0x2f0] sm:$0xff] }
  0x38   :  { %850 = vmatprep.subr.mxu0 %v47_v14  ;;  %881 = vmatprep.subr.mxu1 %v974_v18 }
  0x39   :  { %851 = vmatpush3.msra.mxu0 %v47_v14  ;;  %882 = vmatpush3.msra.mxu1 %v65_v51  ;;  %v157_v14 = vld [vmem:[#allocation6 + $0x380] sm:$0xff] }
  0x3a   :  { %852 = vmatprep.subr.mxu0 %v46_v15  ;;  %883 = vmatprep.subr.mxu1 %v974_v18 }
  0x3b   :  { %853 = vmatpush3.msra.mxu0 %v46_v15  ;;  %884 = vmatpush3.msra.mxu1 %v64_v55  ;;  %v172_v15 = vld [vmem:[#allocation6 + $0x3f8] sm:$0xff] }
  0x3c   :  { %854 = vmatprep.subr.mxu0 %v45_v16  ;;  %885 = vmatprep.subr.mxu1 %v974_v18 }
  0x3d   :  { %855 = vmatpush3.msra.mxu0 %v45_v16  ;;  %886 = vmatpush3.msra.mxu1 %v63_v58  ;;  %v156_v16 = vld [vmem:[#allocation6 + $0x378] sm:$0xff] }
  0x3e   :  { %857 = vmatmul.mubr.f32.vlgmr.msra.gmra.mxu0 %v176_v17  ;;  %719 = vmatprep.subr.mxu0 %v110_v20  ;;  %v171_v17 = vld [vmem:[#allocation6 + $0x3f0] sm:$0xff]  ;;  %v154_v20 = vld [vmem:[#allocation6 + $0x368] sm:$0xff] }
  0x3f   :  { %720 = vmatpush3.msra.mxu0 %v94_v22  ;;  %887 = vmatprep.subr.mxu1 %v974_v18  ;;  %v153_v22 = vld [vmem:[#allocation6 + $0x360] sm:$0xff] }
  0x40   :  { %721 = vmatprep.subr.mxu0 %v109_v23  ;;  %888 = vmatpush3.msra.mxu1 %v62_v62  ;;  %v168_v23 = vld [vmem:[#allocation6 + $0x3d8] sm:$0xff] }
  0x41   :  { %722 = vmatpush3.msra.mxu0 %v93_v25  ;;  %889 = vmatprep.subr.mxu1 %v974_v18  ;;  %v155_v18 = vld [vmem:[#allocation6 + $0x370] sm:$0xff] }
  0x42   :  { %723 = vmatprep.subr.mxu0 %v108_v26  ;;  %890 = vmatpush3.msra.mxu1 %v61_v1  ;;  %v167_v25 = vld [vmem:[#allocation6 + $0x3d0] sm:$0xff]  ;;  %v126_v1 = vld [vmem:[#allocation6 + $0x288] sm:$0xff] }
  0x43   :  { %724 = vmatpush3.msra.mxu0 %v92_v28  ;;  %754 = vmatprep.subr.mxu1 %v142_v6  ;;  %v151_v26 = vld [vmem:[#allocation6 + $0x350] sm:$0xff]  ;;  %v150_v28 = vld [vmem:[#allocation6 + $0x348] sm:$0xff]  ;;  %v124_v6 = vld [vmem:[#allocation6 + $0x278] sm:$0xff] }
  0x44   :  { %725 = vmatprep.subr.mxu0 %v107_v29  ;;  %464 = vmatprep.mubr.f32.mxu0 %v377_v10  ;;  %v165_v29 = vld [vmem:[#allocation6 + $0x3c0] sm:$0xff]  ;;  %v122_v10 = vld [vmem:[#allocation6 + $0x268] sm:$0xff] }
  0x45   :  { %726 = vmatpush3.msra.mxu0 %v91_v31  ;;  %v164_v31 = vld [vmem:[#allocation6 + $0x3b8] sm:$0xff] }
  0x46   :  { %727 = vmatprep.subr.mxu0 %v106_v32  ;;  %v148_v32 = vld [vmem:[#allocation6 + $0x338] sm:$0xff] }
  0x47   :  { %728 = vmatpush3.msra.mxu0 %v90_v34  ;;  %v147_v34 = vld [vmem:[#allocation6 + $0x330] sm:$0xff] }
  0x48   :  { %729 = vmatprep.subr.mxu0 %v105_v35  ;;  %v162_v35 = vld [vmem:[#allocation6 + $0x3a8] sm:$0xff] }
  0x49   :  { %730 = vmatpush3.msra.mxu0 %v89_v37  ;;  %v161_v37 = vld [vmem:[#allocation6 + $0x3a0] sm:$0xff] }
  0x4a   :  { %731 = vmatprep.subr.mxu0 %v104_v38  ;;  %v145_v38 = vld [vmem:[#allocation6 + $0x320] sm:$0xff] }
  0x4b   :  { %732 = vmatpush3.msra.mxu0 %v88_v40  ;;  %v392_v40 = vsub.s32 5, %v1028_v61 }
  0x4c   :  { %733 = vmatprep.subr.mxu0 %v103_v41  ;;  %v144_v41 = vld [vmem:[#allocation6 + $0x318] sm:$0xff] }
  0x4d   :  { %734 = vmatpush3.msra.mxu0 %v87_v43  ;;  %v159_v43 = vld [vmem:[#allocation6 + $0x390] sm:$0xff] }
  0x4e   :  { %735 = vmatprep.subr.mxu0 %v102_v44  ;;  %v393_v44 = vrot.slane %v1035_v3, %v392_v40 }
  0x4f   :  { %736 = vmatpush3.msra.mxu0 %v86_v46  ;;  %v389_v46 = vrot.slane %v1035_v3, %v388_v42 }
  0x50   :  { %737 = vmatprep.subr.mxu0 %v101_v47  ;;  %v1049_v47 = vld [vmem:[#allocation6 + $0x100] sm:$0xff] }
  0x51   :  { %738 = vmatpush3.msra.mxu0 %v85_v49  ;;  %v181_v48 = vrot.slane %v1049_v47, %v180_v5  ;;  %v140_v5 = vld [vmem:[#allocation6 + $0x2f8] sm:$0xff] }
  0x52   :  { %739 = vmatprep.subr.mxu0 %v100_v50 }
  0x53   :  { %740 = vmatpush3.msra.mxu0 %v84_v52 }
  0x54   :  { %741 = vmatprep.subr.mxu0 %v99_v53 }
  0x55   :  { %742 = vmatpush3.msra.mxu0 %v83_v56 }
  0x56   :  { %743 = vmatprep.subr.mxu0 %v98_v57 }
  0x57   :  { %744 = vmatpush3.msra.mxu0 %v82_v59  ;;  %v384_v59 = vsub.s32 3, %v1028_v61 }
  0x58   :  { %745 = vmatprep.subr.mxu0 %v97_v60 }
  0x59   :  { %746 = vmatpush3.msra.mxu0 %v81_v63  ;;  %v385_v63 = vrot.slane %v1035_v3, %v384_v59 }
  0x5a   :  { %747 = vmatprep.subr.mxu0 %v96_v0 }
  0x5b   :  { %748 = vmatpush3.msra.mxu0 %v80_v2  ;;  %v141_v2 = vld [vmem:[#allocation6 + $0x300] sm:$0xff] }
  0x5c   :  { %749 = vmatprep.subr.mxu0 %v95_v4  ;;  %v125_v4 = vld [vmem:[#allocation6 + $0x280] sm:$0xff] }
  0x5d   :  { %750 = vmatpush3.msra.mxu0 %v79_v9  ;;  %v138_v9 = vld [vmem:[#allocation6 + $0x2e8] sm:$0xff] }
  0x5e   :  { %789 = vmatprep.subr.mxu0 %v174_v11  ;;  %465 = vmatmul.mubr.f32.vlgmr.msra.gmra.mxu0 %v373_v8  ;;  %v123_v8 = vld [vmem:[#allocation6 + $0x270] sm:$0xff]  ;;  %v137_v11 = vld [vmem:[#allocation6 + $0x2e0] sm:$0xff] }
  0x5f   :  { %790 = vmatpush3.msra.mxu0 %v158_v12  ;;  %604 = vmatprep.mubr.f32.mxu0 %v393_v44  ;;  %v121_v12 = vld [vmem:[#allocation6 + $0x260] sm:$0xff] }
  0x60   :  { %791 = vmatprep.subr.mxu0 %v173_v13  ;;  %v136_v13 = vld [vmem:[#allocation6 + $0x2d8] sm:$0xff] }
  0x61   :  { %792 = vmatpush3.msra.mxu0 %v157_v14  ;;  %v120_v14 = vld [vmem:[#allocation6 + $0x258] sm:$0xff] }
  0x62   :  { %793 = vmatprep.subr.mxu0 %v172_v15  ;;  %v135_v15 = vld [vmem:[#allocation6 + $0x2d0] sm:$0xff] }
  0x63   :  { %794 = vmatpush3.msra.mxu0 %v156_v16  ;;  %v119_v16 = vld [vmem:[#allocation6 + $0x250] sm:$0xff] }
  0x64   :  { %795 = vmatprep.subr.mxu0 %v171_v17  ;;  %v134_v17 = vld [vmem:[#allocation6 + $0x2c8] sm:$0xff] }
  0x65   :  { %796 = vmatpush3.msra.mxu0 %v155_v18  ;;  %v118_v18 = vld [vmem:[#allocation6 + $0x248] sm:$0xff] }
  0x66   :  { %797 = vmatprep.subr.mxu0 %v170_v19  ;;  %v133_v19 = vld [vmem:[#allocation6 + $0x2c0] sm:$0xff] }
  0x67   :  { %798 = vmatpush3.msra.mxu0 %v154_v20  ;;  %v117_v20 = vld [vmem:[#allocation6 + $0x240] sm:$0xff] }
  0x68   :  { %799 = vmatprep.subr.mxu0 %v169_v21  ;;  %v132_v21 = vld [vmem:[#allocation6 + $0x2b8] sm:$0xff] }
  0x69   :  { %800 = vmatpush3.msra.mxu0 %v153_v22  ;;  %v116_v22 = vld [vmem:[#allocation6 + $0x238] sm:$0xff] }
  0x6a   :  { %801 = vmatprep.subr.mxu0 %v168_v23  ;;  %v131_v23 = vld [vmem:[#allocation6 + $0x2b0] sm:$0xff] }
  0x6b   :  { %802 = vmatpush3.msra.mxu0 %v152_v24  ;;  %v115_v24 = vld [vmem:[#allocation6 + $0x230] sm:$0xff] }
  0x6c   :  { %803 = vmatprep.subr.mxu0 %v167_v25  ;;  %v130_v25 = vld [vmem:[#allocation6 + $0x2a8] sm:$0xff] }
  0x6d   :  { %804 = vmatpush3.msra.mxu0 %v151_v26  ;;  %v114_v26 = vld [vmem:[#allocation6 + $0x228] sm:$0xff] }
  0x6e   :  { %805 = vmatprep.subr.mxu0 %v166_v27  ;;  %v129_v27 = vld [vmem:[#allocation6 + $0x2a0] sm:$0xff] }
  0x6f   :  { %806 = vmatpush3.msra.mxu0 %v150_v28  ;;  %v113_v28 = vld [vmem:[#allocation6 + $0x220] sm:$0xff] }
  0x70   :  { %807 = vmatprep.subr.mxu0 %v165_v29  ;;  %v380_v29 = vsub.s32 2, %v1028_v61  ;;  %v78_v61 = vld [vmem:[#allocation6 + $0x108] sm:$0xff] }
  0x71   :  { %808 = vmatpush3.msra.mxu0 %v149_v30  ;;  %v128_v30 = vld [vmem:[#allocation6 + $0x298] sm:$0xff] }
  0x72   :  { %809 = vmatprep.subr.mxu0 %v164_v31  ;;  %v112_v31 = vld [vmem:[#allocation6 + $0x218] sm:$0xff] }
  0x73   :  { %810 = vmatpush3.msra.mxu0 %v148_v32  ;;  %v127_v32 = vld [vmem:[#allocation6 + $0x290] sm:$0xff] }
  0x74   :  { %811 = vmatprep.subr.mxu0 %v163_v33  ;;  %v111_v33 = vld [vmem:[#allocation6 + $0x210] sm:$0xff] }
  0x75   :  { %812 = vmatpush3.msra.mxu0 %v147_v34  ;;  %v381_v34 = vrot.slane %v1035_v3, %v380_v29 }
  0x76   :  { %813 = vmatprep.subr.mxu0 %v162_v35  ;;  %v337_v35 = vrot.slane %v1049_v47, 1 }
  0x77   :  { %814 = vmatpush3.msra.mxu0 %v146_v36 }
  0x78   :  { %815 = vmatprep.subr.mxu0 %v161_v37 }
  0x79   :  { %816 = vmatpush3.msra.mxu0 %v145_v38  ;;  %v177_v38 = vld [vmem:[%s1072_s2 + $0x10] sm:$0xff] }
  0x7a   :  { %817 = vmatprep.subr.mxu0 %v160_v39  ;;  %v640_v3 = vsub.f32 %v177_v38, %v78_v61 }
  0x7b   :  { %818 = vmatpush3.msra.mxu0 %v144_v41 }
  0x7c   :  { %819 = vmatprep.subr.mxu0 %v159_v43  ;;  %v641_v43 = vmul.f32 %v640_v3, %v640_v3 }
  0x7d   :  { %820 = vmatpush3.msra.mxu0 %v143_v45 }
  0x7e   :  { %605 = vmatmul.mubr.f32.vlgmr.msra.gmra.mxu0 %v389_v46 }
  0xfe   :  { %v858_v49 = vpop.f32.mrf.mxu0 }
  0xff   :  { %v254_v50 = vadd.f32 %v858_v49, %v181_v48 }
 0x100   :  { %v248_v51 = vpop.f32.mrf.mxu0 }
 0x101   :  { %v249_v52 = vadd.f32 %v248_v51, %v181_v48  ;;  %916 = vtanh.f32 %v254_v50 }
 0x103   :  { %918 = vtanh.f32 %v249_v52 }
 0x10e   :  { %v917_v53 = vpop.eup %916 }
 0x110   :  { %v919_v54 = vpop.eup %918 }
 0x111   :  { %v259_v55 = vadd.f32 %v919_v54, %v917_v53 }
 0x113   :  { %v260_v56 = vrot.slane %v259_v55, 4 }
 0x115   :  { %v261_v57 = vadd.f32 %v260_v56, %v259_v55  ;;  %v610_v55 = vrot.slane %v1049_v47, 2 }
 0x117   :  { %v262_v58 = vrot.slane %v261_v57, 2 }
 0x119   :  { %v263_v60 = vadd.f32 %v262_v58, %v261_v57 }
 0x11b   :  { %v264_v62 = vrot.slane %v263_v60, 1 }
 0x11d   :  { %v265_v0 = vadd.f32 %v264_v62, %v263_v60 }
 0x11e   :  { %v751_v44 = vpop.f32.mrf.mxu0 }
 0x11f   :  { %892 = vmatmul.mubr.f32.vlgmr.msra.gmra.mxu1 %v265_v0 }
 0x120   :  { %755 = vmatpush3.msra.mxu1 %v126_v1  ;;  %534 = vmatprep.mubr.f32.mxu1 %v385_v63  ;;  %v752_v45 = vpop.f32.mrf.mxu0 }
 0x121   :  { %756 = vmatprep.subr.mxu1 %v141_v2  ;;  %v753_v51 = vadd.f32 %v752_v45, %v751_v44 }
 0x122   :  { %757 = vmatpush3.msra.mxu1 %v125_v4 }
 0x123   :  { %758 = vmatprep.subr.mxu1 %v140_v5 }
 0x124   :  { %759 = vmatpush3.msra.mxu1 %v124_v6 }
 0x125   :  { %760 = vmatprep.subr.mxu1 %v139_v7 }
 0x126   :  { %761 = vmatpush3.msra.mxu1 %v123_v8 }
 0x127   :  { %762 = vmatprep.subr.mxu1 %v138_v9 }
 0x128   :  { %763 = vmatpush3.msra.mxu1 %v122_v10 }
 0x129   :  { %764 = vmatprep.subr.mxu1 %v137_v11 }
 0x12a   :  { %765 = vmatpush3.msra.mxu1 %v121_v12 }
 0x12b   :  { %766 = vmatprep.subr.mxu1 %v136_v13 }
 0x12c   :  { %767 = vmatpush3.msra.mxu1 %v120_v14 }
 0x12d   :  { %768 = vmatprep.subr.mxu1 %v135_v15 }
 0x12e   :  { %769 = vmatpush3.msra.mxu1 %v119_v16 }
 0x12f   :  { %770 = vmatprep.subr.mxu1 %v134_v17 }
 0x130   :  { %771 = vmatpush3.msra.mxu1 %v118_v18 }
 0x131   :  { %772 = vmatprep.subr.mxu1 %v133_v19 }
 0x132   :  { %773 = vmatpush3.msra.mxu1 %v117_v20 }
 0x133   :  { %774 = vmatprep.subr.mxu1 %v132_v21 }
 0x134   :  { %775 = vmatpush3.msra.mxu1 %v116_v22 }
 0x135   :  { %776 = vmatprep.subr.mxu1 %v131_v23 }
 0x136   :  { %777 = vmatpush3.msra.mxu1 %v115_v24 }
 0x137   :  { %778 = vmatprep.subr.mxu1 %v130_v25 }
 0x138   :  { %779 = vmatpush3.msra.mxu1 %v114_v26 }
 0x139   :  { %780 = vmatprep.subr.mxu1 %v129_v27 }
 0x13a   :  { %781 = vmatpush3.msra.mxu1 %v113_v28 }
 0x13b   :  { %782 = vmatprep.subr.mxu1 %v128_v30 }
 0x13c   :  { %783 = vmatpush3.msra.mxu1 %v112_v31 }
 0x13d   :  { %784 = vmatprep.subr.mxu1 %v127_v32 }
 0x13e   :  { %785 = vmatpush3.msra.mxu1 %v111_v33  ;;  %v821_v46 = vpop.f32.mrf.mxu0 }
 0x13f   :  { %535 = vmatmul.mubr.f32.vlgmr.msra.gmra.mxu1 %v381_v34 }
 0x140   :  { %v822_v49 = vpop.f32.mrf.mxu0 }
 0x141   :  { %v823_v53 = vadd.f32 %v822_v49, %v821_v46 }
 0x1df   :  { %v332_v36 = vpop.f32.mrf.mxu1 }
 0x1e0   :  { %v339_v37 = vmul.f32 %v337_v35, %v332_v36  ;;  %v351_v40 = vmul.f32 %v332_v36, %v332_v36 }
 0x1e1   :  { %v893_v39 = vpop.f32.mrf.mxu1 }
 0x1e2   :  { %v341_v41 = vsel %vm340_vm1, %v339_v37, 0.0  ;;  %v352_v42 = vsel %vm340_vm1, %v351_v40, 0.0 }
 0x1e3   :  { %342 = vadd.xlane.f32.xlu0 %v341_v41 }
 0x1e7   :  { %353 = vadd.xlane.f32.xlu0 %v352_v42 }
 0x1eb   :  { %642 = vadd.xlane.f32.xlu0 %v641_v43 }
 0x1ff   :  { %v786_v48 = vpop.f32.mrf.mxu1 }
 0x201   :  { %v787_v50 = vpop.f32.mrf.mxu1 }
 0x202   :  { %v788_v52 = vadd.f32 %v787_v50, %v786_v48 }
 0x204   :  { %v537_v54 = vadd.f32 %v788_v52, %v753_v51 }
 0x206   :  { %v607_v56 = vadd.f32 %v823_v53, %v537_v54 }
 0x208   :  { %v612_v57 = vmul.f32 %v610_v55, %v607_v56  ;;  %v623_v59 = vmul.f32 %v607_v56, %v607_v56 }
 0x20a   :  { %v613_v58 = vsel %vm340_vm1, %v612_v57, 0.0  ;;  %v624_v60 = vsel %vm340_vm1, %v623_v59, 0.0 }
 0x20b   :  { %614 = vadd.xlane.f32.xlu1 %v613_v58 }
 0x20f   :  { %625 = vadd.xlane.f32.xlu1 %v624_v60 }
 0x26c   :  { %v343_v62 = vpop.xlane.xlu0 %342 }
 0x26d   :  { %v344_v63 = vrot.slane %v343_v62, 4 }
 0x26f   :  { %v345_v0 = vadd.f32 %v344_v63, %v343_v62 }
 0x270   :  { %v354_v1 = vpop.xlane.xlu0 %353 }
 0x271   :  { %v346_v2 = vrot.slane %v345_v0, 2  ;;  %v355_v4 = vrot.slane %v354_v1, 4 }
 0x273   :  { %v356_v5 = vadd.f32 %v355_v4, %v354_v1  ;;  %v347_v6 = vadd.f32 %v346_v2, %v345_v0 }
 0x274   :  { %v643_v28 = vpop.xlane.xlu0 %642 }
 0x275   :  { %v357_v7 = vrot.slane %v356_v5, 2  ;;  %v348_v8 = vrot.slane %v347_v6, 1  ;;  %v644_v29 = vrot.slane %v643_v28, 4 }
 0x277   :  { %v349_v47 = vadd.f32 %v348_v8, %v347_v6  ;;  %v358_v9 = vadd.f32 %v357_v7, %v356_v5  ;;  %v645_v30 = vadd.f32 %v644_v29, %v643_v28 }
 0x279   :  { %894 = vpush %v349_v47  ;;  %v359_v10 = vrot.slane %v358_v9, 1  ;;  %v646_v32 = vrot.slane %v645_v30, 2 }
 0x27b   :  { %v360_v11 = vadd.f32 %v359_v10, %v358_v9  ;;  %v647_v33 = vadd.f32 %v646_v32, %v645_v30 }
 0x27d   :  { %896 = vpush %v360_v11  ;;  %v648_v34 = vrot.slane %v647_v33, 1 }
 0x27f   :  { %v649_v36 = vadd.f32 %v648_v34, %v647_v33 }
 0x294   :  { %v615_v12 = vpop.xlane.xlu1 %614 }
 0x295   :  { %v616_v14 = vrot.slane %v615_v12, 4 }
 0x297   :  { %v617_v16 = vadd.f32 %v616_v14, %v615_v12 }
 0x298   :  { %v626_v13 = vpop.xlane.xlu1 %625 }
 0x299   :  { %v627_v15 = vrot.slane %v626_v13, 4  ;;  %v618_v19 = vrot.slane %v617_v16, 2 }
 0x29b   :  { %v628_v17 = vadd.f32 %v627_v15, %v626_v13  ;;  %v619_v21 = vadd.f32 %v618_v19, %v617_v16 }
 0x29d   :  { %v629_v20 = vrot.slane %v628_v17, 2  ;;  %v620_v23 = vrot.slane %v619_v21, 1 }
 0x29f   :  { %v630_v22 = vadd.f32 %v629_v20, %v628_v17  ;;  %v621_v26 = vadd.f32 %v620_v23, %v619_v21 }
 0x2a1   :  { %v631_v24 = vrot.slane %v630_v22, 1 }
 0x2a3   :  { %v632_v27 = vadd.f32 %v631_v24, %v630_v22 }
 0x2aa   :  { %s895_s2 = spop %894 }
 0x2ae   :  { %s897_s6 = spop %896 }
 0x2af   :  { %s362_s7 = sadd.f32 1e-12, %s897_s6 }
 0x2b1   :  { %v363_v18 = vstv %s362_s7 }
 0x2b2   :  { %920 = vrsqrt.f32 %v363_v18 }
 0x2bf   :  { %v921_v25 = vpop.eup %920 }
 0x2c0   :  { %898 = vpush %v921_v25 }
 0x2c1   :  { %900 = vpush %v621_v26 }
 0x2c2   :  { %902 = vpush %v632_v27 }
 0x2f1   :  { %s899_s8 = spop %898 }
 0x2f2   :  { %s366_s9 = smul.f32 %s899_s8, %s895_s2  ;;  %s901_s10 = spop %900 }
 0x2f3   :  { %s903_s11 = spop %902 }
 0x2f4   :  { %s367_s12 = ssub.f32 1.0, %s366_s9 }
 0x2f5   :  { %s634_s13 = sadd.f32 1e-12, %s903_s11 }
 0x2f6   :  { %663 = sst [smem:[#allocation7 + $0x1]] %s367_s12 }
 0x2f7   :  { %v635_v31 = vstv %s634_s13 }
 0x2f8   :  { %922 = vrsqrt.f32 %v635_v31 }
 0x305   :  { %v923_v35 = vpop.eup %922 }
 0x306   :  { %904 = vpush %v923_v35 }
 0x307   :  { %906 = vpush %v649_v36 }
 0x337   :  { %s905_s16 = spop %904 }
 0x338   :  { %s638_s17 = smul.f32 %s905_s16, %s901_s10  ;;  %s907_s18 = spop %906 }
 0x339   :  { %s651_s21 = smul.f32 0.00390625, %s907_s18 }
 0x33a   :  { %s639_s22 = ssub.f32 1.0, %s638_s17 }
 0x33b   :  { %667 = sst [smem:[#allocation7 + $0x3]] %s651_s21  ;;  %s658_s25 = smul.f32 %s655_s0, %s651_s21 }
 0x33c   :  { %s656_s23 = smul.f32 %s653_s20, %s639_s22  ;;  %665 = sst [smem:[#allocation7 + $0x2]] %s639_s22 }
 0x33e   :  { %s657_s24 = sadd.f32 %s656_s23, %s367_s12 }
 0x340   :  { %s659_s26 = sadd.f32 %s658_s25, %s657_s24 }
 0x342   :  { %661 = sst [smem:[#allocation7]] %s659_s26 }
 0x343   :  { %675 = dma.smem_to_hbm %s977_s27, 16, %s1074_s4, [#allocation4]  }
 0x344   :  { %968 = dma.done.wait [#allocation4], 16  }
 0x345   :  { %969 = vsyncadd [#allocation4], 4294967280 }
 0x346   :  { %679 = sfence }
 0x347   :  { %680 = vsyncpa [#allocation3], 1 }
 0x348   :  { %681 = vsyncpa [#allocation4], 1 }
 0x349   :  { %682 = vsyncpa [#allocation5], 1 }

</bundles_post_ra>
